<compile_context>
chip_gen: v7x
topology: tpu7x:2x2x1
jax: 0.10.0
libtpu: 0.0.40
codegen_flags: <defaults>
</compile_context>

<pallas_src>
import functools

import numpy as np
import jax
import jax.numpy as jnp
from jax import lax
from jax.experimental import pallas as pl
from jax.experimental.pallas import tpu as pltpu

NEG_SLOPE = 0.2          # LeakyReLU(0.2)
BN_EPS = 1e-5            # nn.BatchNorm1d default eps
KERNEL = 4
STRIDE = 2
PAD = 1
VMEM_LIMIT_BYTES = 32 * 1024 * 1024   # explicit cap; safe on v5e/v6e/v7x


# ---------------------------------------------------------------------------
# helpers
# ---------------------------------------------------------------------------
def _full_spec(shape):
    nd = len(shape)
    return pl.BlockSpec(shape, lambda: (0,) * nd)   # grid=() -> whole array


def _pick_tile_n(n):
    for t in (8, 4, 2, 1):
        if n % t == 0:
            return t
    return 1


def _prep_conv_weights(w):
    """torch (C_out, C_in, K=4) -> two (2*C_in, C_out) bf16 blocks (taps 0,1 / 2,3)."""
    c_out, c_in, _ = w.shape
    wt = jnp.transpose(w, (2, 1, 0))                       # (K, C_in, C_out)
    wa = wt[0:2].reshape(2 * c_in, c_out).astype(jnp.bfloat16)
    wb = wt[2:4].reshape(2 * c_in, c_out).astype(jnp.bfloat16)
    return wa, wb


# ---------------------------------------------------------------------------
# Pallas kernels
# ---------------------------------------------------------------------------
def _conv0_lrelu_kernel(x_ref, wa_ref, wb_ref, b_ref, o_ref):
    """Layer 0: conv + bias + LeakyReLU for a tile of TILE_N batch elements.

    x: (TILE_N, L_out+1, 2*C_in) bf16  (paired, length-padded input)
    o: (TILE_N, L_out+2, C_out)  bf16  (rows 0 and L_out+1 are the zero pads
                                        consumed by the next layer's conv)
    """
    tile_n, lp, _ = x_ref.shape
    l_out = lp - 1
    c_out = o_ref.shape[-1]
    wa = wa_ref[...]
    wb = wb_ref[...]
    bias = b_ref[...]
    zero_row = jnp.zeros((1, c_out), o_ref.dtype)
    for j in range(tile_n):                     # small static unroll
        a = x_ref[j, 0:l_out, :]                # kernel taps 0, 1
        b = x_ref[j, 1:lp, :]                   # kernel taps 2, 3
        y = (jnp.dot(a, wa, preferred_element_type=jnp.float32)
             + jnp.dot(b, wb, preferred_element_type=jnp.float32)
             + bias)
        y = jnp.where(y >= 0.0, y, NEG_SLOPE * y)
        o_ref[j, 1:1 + l_out, :] = y.astype(o_ref.dtype)
        o_ref[j, 0:1, :] = zero_row
        o_ref[j, 1 + l_out:2 + l_out, :] = zero_row


def _conv_bn_lrelu_body(mask_ref, x_ref, wa_ref, wb_ref, g_ref, beta_ref,
                        n_batch, l_out):
    """Shared conv (two MXU matmuls over the whole batch) + batch-stat BN + LeakyReLU.

    x: (N*(l_out+1), 2*C_in) paired layout.  Row r = n*(l_out+1)+l is conv
    output (n, l) for l < l_out; the N-1 rows with l == l_out straddle two
    batch elements -> masked out of the statistics, never copied to output.
    """
    lp = l_out + 1
    r = n_batch * lp
    m_true = float(n_batch * l_out)
    a = x_ref[0:r - 1, :]                       # kernel taps 0, 1
    b = x_ref[1:r, :]                           # kernel taps 2, 3
    y = (jnp.dot(a, wa_ref[...], preferred_element_type=jnp.float32)
         + jnp.dot(b, wb_ref[...], preferred_element_type=jnp.float32))
    mask = mask_ref[...]                        # (r-1, 1) f32; 0 on cross-batch rows
    mean = jnp.sum(y * mask, axis=0, keepdims=True) / m_true
    var = jnp.sum(((y - mean) * mask) ** 2, axis=0, keepdims=True) / m_true
    scale = g_ref[...] * lax.rsqrt(var + BN_EPS)     # gamma folded into scale
    shift = beta_ref[...] - mean * scale             # conv bias dropped (cancels)
    z = y * scale + shift
    return jnp.where(z >= 0.0, z, NEG_SLOPE * z)


def _conv_bn_lrelu_kernel(mask_ref, x_ref, wa_ref, wb_ref, g_ref, beta_ref,
                          o_ref, z_ref, *, n_batch, l_out):
    """Conv + BN + LeakyReLU, output written in padded (N*(l_out+2), C) layout."""
    z_ref[...] = _conv_bn_lrelu_body(mask_ref, x_ref, wa_ref, wb_ref,
                                     g_ref, beta_ref, n_batch, l_out)
    lp = l_out + 1
    c_out = o_ref.shape[-1]
    zero_row = jnp.zeros((1, c_out), o_ref.dtype)

    def copy_out(n, carry):
        base = n * (l_out + 2)
        o_ref[pl.ds(base, 1), :] = zero_row
        o_ref[pl.ds(base + 1, l_out), :] = (
            z_ref[pl.ds(n * lp, l_out), :].astype(o_ref.dtype))
        o_ref[pl.ds(base + 1 + l_out, 1), :] = zero_row
        return carry

    lax.fori_loop(0, n_batch, copy_out, 0)


def _conv_bn_lrelu_linear_kernel(mask_ref, x_ref, wa_ref, wb_ref, g_ref,
                                 beta_ref, wl_ref, bl_ref, o_ref, z_ref,
                                 *, n_batch, l_out):
    """Last conv layer with the final Linear(final_size*max_ch, 1) fused in."""
    z_ref[...] = _conv_bn_lrelu_body(mask_ref, x_ref, wa_ref, wb_ref,
                                     g_ref, beta_ref, n_batch, l_out)
    lp = l_out + 1
    wl = wl_ref[...]            # (l_out, C_out); torch flatten order pre-applied
    bl = bl_ref[...]            # (1, 1)

    def linear_out(n, carry):
        act = z_ref[pl.ds(n * lp, l_out), :]
        val = jnp.sum(act * wl, axis=(0, 1), keepdims=True)
        o_ref[pl.ds(n, 1), :] = val + bl
        return carry

    lax.fori_loop(0, n_batch, linear_out, 0)


# ---------------------------------------------------------------------------
# Forward pass
# ---------------------------------------------------------------------------
def data_discriminator_forward(x, conv_params, w_lin, b_lin):
    n, c_in, l0 = x.shape
    n_layers = len(conv_params)
    assert n_layers >= 2, "need data_size >= 16 (first conv + >=1 BN conv layer)"

    # ---- layer 0: conv + bias + LeakyReLU, tiled over batch ("parallel") ----
    p0 = conv_params[0]
    c1 = p0["w"].shape[0]
    l1 = l0 // STRIDE
    xp = jnp.transpose(x, (0, 2, 1))                        # NCL -> NLC (once)
    xp = jnp.pad(xp, ((0, 0), (PAD, PAD), (0, 0)))
    xp = xp.reshape(n, l1 + 1, 2 * c_in).astype(jnp.bfloat16)
    wa0, wb0 = _prep_conv_weights(p0["w"])
    bias0 = p0["b"].reshape(1, c1).astype(jnp.float32)
    tile_n = _pick_tile_n(n)
    out0 = pl.pallas_call(
        _conv0_lrelu_kernel,
        out_shape=jax.ShapeDtypeStruct((n, l1 + 2, c1), jnp.bfloat16),
        grid=(n // tile_n,),
        in_specs=[
            pl.BlockSpec((tile_n, l1 + 1, 2 * c_in), lambda i: (i, 0, 0)),
            pl.BlockSpec((2 * c_in, c1), lambda i: (0, 0)),
            pl.BlockSpec((2 * c_in, c1), lambda i: (0, 0)),
            pl.BlockSpec((1, c1), lambda i: (0, 0)),
        ],
        out_specs=pl.BlockSpec((tile_n, l1 + 2, c1), lambda i: (i, 0, 0)),
        compiler_params=pltpu.CompilerParams(
            dimension_semantics=("parallel",),
            vmem_limit_bytes=VMEM_LIMIT_BYTES),
    )(xp, wa0, wb0, bias0)

    # inter-layer layout: padded (N*(L+2), C); pairing for the next conv is a
    # free reshape (no data movement).
    act = out0.reshape(n * (l1 + 2), c1)
    l_in = l1

    # ---- BatchNorm conv layers (whole batch resident: BN needs batch stats) ----
    # TODO(synk): for N*L large enough to overflow VMEM this needs a two-pass
    # tiled BN (accumulate sum/sumsq, then normalize); not needed at these sizes.
    for li in range(1, n_layers):
        p = conv_params[li]
        c_out = p["w"].shape[0]
        c_prev = act.shape[-1]
        l_out = l_in // STRIDE
        lp = l_out + 1
        r = n * lp
        xp = act.reshape(r, 2 * c_prev)                     # free reshape
        wa, wb = _prep_conv_weights(p["w"])
        gamma = p["gamma"].reshape(1, c_out).astype(jnp.float32)
        beta = p["beta"].reshape(1, c_out).astype(jnp.float32)
        mask = jnp.asarray(
            (np.arange(r - 1) % lp < l_out).astype(np.float32).reshape(r - 1, 1))

        if li < n_layers - 1:
            kern = functools.partial(_conv_bn_lrelu_kernel,
                                     n_batch=n, l_out=l_out)
            act = pl.pallas_call(
                kern,
                out_shape=jax.ShapeDtypeStruct((n * (l_out + 2), c_out),
                                               jnp.bfloat16),
                in_specs=[_full_spec(mask.shape), _full_spec(xp.shape),
                          _full_spec(wa.shape), _full_spec(wb.shape),
                          _full_spec(gamma.shape), _full_spec(beta.shape)],
                out_specs=_full_spec((n * (l_out + 2), c_out)),
                scratch_shapes=[pltpu.VMEM((r - 1, c_out), jnp.float32)],
                compiler_params=pltpu.CompilerParams(
                    vmem_limit_bytes=VMEM_LIMIT_BYTES),
            )(mask, xp, wa, wb, gamma, beta)
            l_in = l_out
        else:
            # last conv layer: fuse the final Linear as an epilogue.
            assert l_out == 4 and w_lin.size == 4 * c_out
            # torch flattens (N, C, 4) channel-major; fold that order into wl.
            wl = w_lin.reshape(c_out, 4).T.astype(jnp.float32)   # (4, C_out)
            bl = b_lin.reshape(1, 1).astype(jnp.float32)
            kern = functools.partial(_conv_bn_lrelu_linear_kernel,
                                     n_batch=n, l_out=l_out)
            return pl.pallas_call(
                kern,
                out_shape=jax.ShapeDtypeStruct((n, 1), jnp.float32),
                in_specs=[_full_spec(mask.shape), _full_spec(xp.shape),
                          _full_spec(wa.shape), _full_spec(wb.shape),
                          _full_spec(gamma.shape), _full_spec(beta.shape),
                          _full_spec(wl.shape), _full_spec(bl.shape)],
                out_specs=_full_spec((n, 1)),
                scratch_shapes=[pltpu.VMEM((r - 1, c_out), jnp.float32)],
                compiler_params=pltpu.CompilerParams(
                    vmem_limit_bytes=VMEM_LIMIT_BYTES),
            )(mask, xp, wa, wb, gamma, beta, wl, bl)


# ---------------------------------------------------------------------------
# Parameter construction (matches the module's parameter shapes)
# ---------------------------------------------------------------------------
def init_params(key, data_size, input_channel):
    layer_num = int(np.log2(data_size)) - 3
    max_ch = data_size * 2
    params = []
    prev = input_channel
    for i in range(layer_num + 1):
        c_out = max_ch // 2 ** (layer_num - i)
        key, kw, kb = jax.random.split(key, 3)
        w = jax.random.normal(kw, (c_out, prev, KERNEL), jnp.float32) * 0.1
        b = jax.random.normal(kb, (c_out,), jnp.float32) * 0.1
        if i == 0:
            params.append(dict(w=w, b=b, gamma=None, beta=None))
        else:
            params.append(dict(w=w, b=b,
                               gamma=jnp.ones((c_out,), jnp.float32),
                               beta=jnp.zeros((c_out,), jnp.float32)))
        prev = c_out
    key, kw, kb = jax.random.split(key, 3)
    w_lin = jax.random.normal(kw, (1, 4 * max_ch), jnp.float32) * 0.1
    b_lin = jax.random.normal(kb, (1,), jnp.float32) * 0.1
    return params, w_lin, b_lin


# ---------------------------------------------------------------------------
# Pure-numpy float64 reference (independent implementation)
# ---------------------------------------------------------------------------
def _ref_forward(x, conv_params, w_lin, b_lin):
    x = np.asarray(x, np.float64)
    for p in conv_params:
        w = np.asarray(p["w"], np.float64)
        b = np.asarray(p["b"], np.float64)
        nb, c, l = x.shape
        c_out = w.shape[0]
        xp = np.pad(x, ((0, 0), (0, 0), (PAD, PAD)))
        l_out = (l + 2 * PAD - KERNEL) // STRIDE + 1
        y = np.zeros((nb, c_out, l_out))
        for j in range(l_out):
            seg = xp[:, :, STRIDE * j:STRIDE * j + KERNEL]      # (N, C, K)
            y[:, :, j] = np.einsum("nck,ock->no", seg, w) + b
        if p["gamma"] is not None:
            mean = y.mean(axis=(0, 2), keepdims=True)
            var = y.var(axis=(0, 2), keepdims=True)             # biased
            y = (y - mean) / np.sqrt(var + BN_EPS)
            y = (y * np.asarray(p["gamma"], np.float64)[None, :, None]
                 + np.asarray(p["beta"], np.float64)[None, :, None])
        x = np.where(y >= 0, y, NEG_SLOPE * y)
    flat = x.reshape(x.shape[0], -1)
    return flat @ np.asarray(w_lin, np.float64).T + np.asarray(b_lin, np.float64)


if __name__ == "__main__":
    batch = 2
    input_channel = 4
    hidden_size = 32   # stored by the module but unused in forward()

    fwd = jax.jit(data_discriminator_forward)

    # data_size=16 -> 2 conv layers; data_size=32 -> 3 layers, exercising the
    # standalone BN-layer kernel in addition to the first & fused-linear ones.
    for data_size in (16, 32):
        key = jax.random.PRNGKey(0)
        key, kx = jax.random.split(key)
        x = jax.random.normal(kx, (batch, input_channel, data_size), jnp.float32)
        conv_params, w_lin, b_lin = init_params(key, data_size, input_channel)

        out = fwd(x, conv_params, w_lin, b_lin)
        out = jax.block_until_ready(out)
        assert out.shape == (batch, 1)

        ref = _ref_forward(np.asarray(x), conv_params, w_lin, b_lin)
        # bf16 activations/weights on the MXU -> looser tolerance than pure f32.
        np.testing.assert_allclose(np.asarray(out, np.float64), ref,
                                   rtol=5e-2, atol=5e-2)

    # TODO(synk): BatchNorm1d running-mean/var buffer updates (a training-time
    # side effect) are not modeled; the forward value does not depend on them.
    print("KERNEL_OK")
</pallas_src>

<mosaic_0001>
module attributes {stable_mosaic.version = 11 : i64} {
  func.func @_conv0_lrelu_kernel(%arg0: i32, %arg1: memref<2x9x8xbf16, #tpu.memory_space<vmem>>, %arg2: memref<8x16xbf16, #tpu.memory_space<vmem>>, %arg3: memref<8x16xbf16, #tpu.memory_space<vmem>>, %arg4: memref<1x16xf32, #tpu.memory_space<vmem>>, %arg5: memref<2x10x16xbf16, #tpu.memory_space<vmem>>) attributes {dimension_semantics = [#tpu.dimension_semantics<parallel>], iteration_bounds = array<i64: 1>, scalar_prefetch = 0 : i64, scratch_operands = 0 : i64, tpu.core_type = #tpu.core_type<tc>, window_params = [{transform_indices = @transform_0, window_bounds = array<i64: 2, 9, 8>}, {pipeline_mode = #tpu.pipeline_mode<synchronous>, transform_indices = @transform_1, window_bounds = array<i64: 8, 16>}, {pipeline_mode = #tpu.pipeline_mode<synchronous>, transform_indices = @transform_2, window_bounds = array<i64: 8, 16>}, {pipeline_mode = #tpu.pipeline_mode<synchronous>, transform_indices = @transform_3, window_bounds = array<i64: 1, 16>}, {transform_indices = @transform_4, window_bounds = array<i64: 2, 10, 16>}]} {
    %c0 = arith.constant 0 : index
    %c0_0 = arith.constant 0 : index
    %0 = vector.load %arg2[%c0, %c0_0] : memref<8x16xbf16, #tpu.memory_space<vmem>>, vector<8x16xbf16>
    %c0_1 = arith.constant 0 : index
    %c0_2 = arith.constant 0 : index
    %1 = vector.load %arg3[%c0_1, %c0_2] : memref<8x16xbf16, #tpu.memory_space<vmem>>, vector<8x16xbf16>
    %c0_3 = arith.constant 0 : index
    %c0_4 = arith.constant 0 : index
    %2 = vector.load %arg4[%c0_3, %c0_4] : memref<1x16xf32, #tpu.memory_space<vmem>>, vector<1x16xf32>
    %cst = arith.constant 0.000000e+00 : bf16
    %3 = vector.broadcast %cst : bf16 to vector<1x16xbf16>
    %c0_5 = arith.constant 0 : index
    %c0_6 = arith.constant 0 : index
    %c0_7 = arith.constant 0 : index
    %4 = vector.load %arg1[%c0_5, %c0_6, %c0_7] : memref<2x9x8xbf16, #tpu.memory_space<vmem>>, vector<1x8x8xbf16>
    %5 = vector.shape_cast %4 : vector<1x8x8xbf16> to vector<8x8xbf16>
    %c0_8 = arith.constant 0 : index
    %c1 = arith.constant 1 : index
    %c0_9 = arith.constant 0 : index
    %6 = vector.load %arg1[%c0_8, %c1, %c0_9] : memref<2x9x8xbf16, #tpu.memory_space<vmem>>, vector<1x8x8xbf16>
    %7 = vector.shape_cast %6 : vector<1x8x8xbf16> to vector<8x8xbf16>
    %cst_10 = arith.constant dense<0.000000e+00> : vector<8x16xf32>
    %8 = tpu.matmul %5, %0, %cst_10 {dimension_numbers = #tpu.dot_dimension_numbers<[1], [0], [0], [1], [0, 0, 1, 1], [], []>} : vector<8x8xbf16>, vector<8x16xbf16>, vector<8x16xf32> -> vector<8x16xf32>
    %cst_11 = arith.constant dense<0.000000e+00> : vector<8x16xf32>
    %9 = tpu.matmul %7, %1, %cst_11 {dimension_numbers = #tpu.dot_dimension_numbers<[1], [0], [0], [1], [0, 0, 1, 1], [], []>} : vector<8x8xbf16>, vector<8x16xbf16>, vector<8x16xf32> -> vector<8x16xf32>
    %10 = arith.addf %8, %9 : vector<8x16xf32>
    %11 = vector.broadcast %2 : vector<1x16xf32> to vector<8x16xf32>
    %12 = arith.addf %10, %11 : vector<8x16xf32>
    %cst_12 = arith.constant 0.000000e+00 : f32
    %13 = vector.broadcast %cst_12 : f32 to vector<8x16xf32>
    %14 = arith.cmpf oge, %12, %13 : vector<8x16xf32>
    %cst_13 = arith.constant 2.000000e-01 : f32
    %15 = vector.broadcast %cst_13 : f32 to vector<8x16xf32>
    %16 = arith.mulf %15, %12 : vector<8x16xf32>
    %17 = arith.select %14, %12, %16 : vector<8x16xi1>, vector<8x16xf32>
    %18 = arith.truncf %17 : vector<8x16xf32> to vector<8x16xbf16>
    %c0_14 = arith.constant 0 : index
    %c1_15 = arith.constant 1 : index
    %c0_16 = arith.constant 0 : index
    %19 = vector.load %arg5[%c0_14, %c1_15, %c0_16] : memref<2x10x16xbf16, #tpu.memory_space<vmem>>, vector<1x8x16xbf16>
    %20 = vector.shape_cast %19 : vector<1x8x16xbf16> to vector<8x16xbf16>
    %21 = vector.shape_cast %18 : vector<8x16xbf16> to vector<1x8x16xbf16>
    tpu.vector_store %arg5[%c0_14, %c1_15, %c0_16], %21 {strides = array<i32>} : memref<2x10x16xbf16, #tpu.memory_space<vmem>>, vector<1x8x16xbf16>,
    %c0_17 = arith.constant 0 : index
    %c0_18 = arith.constant 0 : index
    %c0_19 = arith.constant 0 : index
    %22 = vector.load %arg5[%c0_17, %c0_18, %c0_19] : memref<2x10x16xbf16, #tpu.memory_space<vmem>>, vector<1x1x16xbf16>
    %23 = vector.shape_cast %22 : vector<1x1x16xbf16> to vector<1x16xbf16>
    %24 = vector.shape_cast %3 : vector<1x16xbf16> to vector<1x1x16xbf16>
    tpu.vector_store %arg5[%c0_17, %c0_18, %c0_19], %24 {strides = array<i32>} : memref<2x10x16xbf16, #tpu.memory_space<vmem>>, vector<1x1x16xbf16>,
    %c0_20 = arith.constant 0 : index
    %c9 = arith.constant 9 : index
    %c0_21 = arith.constant 0 : index
    %25 = vector.load %arg5[%c0_20, %c9, %c0_21] : memref<2x10x16xbf16, #tpu.memory_space<vmem>>, vector<1x1x16xbf16>
    %26 = vector.shape_cast %25 : vector<1x1x16xbf16> to vector<1x16xbf16>
    %27 = vector.shape_cast %3 : vector<1x16xbf16> to vector<1x1x16xbf16>
    tpu.vector_store %arg5[%c0_20, %c9, %c0_21], %27 {strides = array<i32>} : memref<2x10x16xbf16, #tpu.memory_space<vmem>>, vector<1x1x16xbf16>,
    %c1_22 = arith.constant 1 : index
    %c0_23 = arith.constant 0 : index
    %c0_24 = arith.constant 0 : index
    %28 = vector.load %arg1[%c1_22, %c0_23, %c0_24] : memref<2x9x8xbf16, #tpu.memory_space<vmem>>, vector<1x8x8xbf16>
    %29 = vector.shape_cast %28 : vector<1x8x8xbf16> to vector<8x8xbf16>
    %c1_25 = arith.constant 1 : index
    %c1_26 = arith.constant 1 : index
    %c0_27 = arith.constant 0 : index
    %30 = vector.load %arg1[%c1_25, %c1_26, %c0_27] : memref<2x9x8xbf16, #tpu.memory_space<vmem>>, vector<1x8x8xbf16>
    %31 = vector.shape_cast %30 : vector<1x8x8xbf16> to vector<8x8xbf16>
    %cst_28 = arith.constant dense<0.000000e+00> : vector<8x16xf32>
    %32 = tpu.matmul %29, %0, %cst_28 {dimension_numbers = #tpu.dot_dimension_numbers<[1], [0], [0], [1], [0, 0, 1, 1], [], []>} : vector<8x8xbf16>, vector<8x16xbf16>, vector<8x16xf32> -> vector<8x16xf32>
    %cst_29 = arith.constant dense<0.000000e+00> : vector<8x16xf32>
    %33 = tpu.matmul %31, %1, %cst_29 {dimension_numbers = #tpu.dot_dimension_numbers<[1], [0], [0], [1], [0, 0, 1, 1], [], []>} : vector<8x8xbf16>, vector<8x16xbf16>, vector<8x16xf32> -> vector<8x16xf32>
    %34 = arith.addf %32, %33 : vector<8x16xf32>
    %35 = vector.broadcast %2 : vector<1x16xf32> to vector<8x16xf32>
    %36 = arith.addf %34, %35 : vector<8x16xf32>
    %cst_30 = arith.constant 0.000000e+00 : f32
    %37 = vector.broadcast %cst_30 : f32 to vector<8x16xf32>
    %38 = arith.cmpf oge, %36, %37 : vector<8x16xf32>
    %cst_31 = arith.constant 2.000000e-01 : f32
    %39 = vector.broadcast %cst_31 : f32 to vector<8x16xf32>
    %40 = arith.mulf %39, %36 : vector<8x16xf32>
    %41 = arith.select %38, %36, %40 : vector<8x16xi1>, vector<8x16xf32>
    %42 = arith.truncf %41 : vector<8x16xf32> to vector<8x16xbf16>
    %c1_32 = arith.constant 1 : index
    %c1_33 = arith.constant 1 : index
    %c0_34 = arith.constant 0 : index
    %43 = vector.load %arg5[%c1_32, %c1_33, %c0_34] : memref<2x10x16xbf16, #tpu.memory_space<vmem>>, vector<1x8x16xbf16>
    %44 = vector.shape_cast %43 : vector<1x8x16xbf16> to vector<8x16xbf16>
    %45 = vector.shape_cast %42 : vector<8x16xbf16> to vector<1x8x16xbf16>
    tpu.vector_store %arg5[%c1_32, %c1_33, %c0_34], %45 {strides = array<i32>} : memref<2x10x16xbf16, #tpu.memory_space<vmem>>, vector<1x8x16xbf16>,
    %c1_35 = arith.constant 1 : index
    %c0_36 = arith.constant 0 : index
    %c0_37 = arith.constant 0 : index
    %46 = vector.load %arg5[%c1_35, %c0_36, %c0_37] : memref<2x10x16xbf16, #tpu.memory_space<vmem>>, vector<1x1x16xbf16>
    %47 = vector.shape_cast %46 : vector<1x1x16xbf16> to vector<1x16xbf16>
    %48 = vector.shape_cast %3 : vector<1x16xbf16> to vector<1x1x16xbf16>
    tpu.vector_store %arg5[%c1_35, %c0_36, %c0_37], %48 {strides = array<i32>} : memref<2x10x16xbf16, #tpu.memory_space<vmem>>, vector<1x1x16xbf16>,
    %c1_38 = arith.constant 1 : index
    %c9_39 = arith.constant 9 : index
    %c0_40 = arith.constant 0 : index
    %49 = vector.load %arg5[%c1_38, %c9_39, %c0_40] : memref<2x10x16xbf16, #tpu.memory_space<vmem>>, vector<1x1x16xbf16>
    %50 = vector.shape_cast %49 : vector<1x1x16xbf16> to vector<1x16xbf16>
    %51 = vector.shape_cast %3 : vector<1x16xbf16> to vector<1x1x16xbf16>
    tpu.vector_store %arg5[%c1_38, %c9_39, %c0_40], %51 {strides = array<i32>} : memref<2x10x16xbf16, #tpu.memory_space<vmem>>, vector<1x1x16xbf16>,
    return
  }
  func.func @transform_0(%arg0: i32) -> (i32, i32, i32) {
    %c0_i32 = arith.constant 0 : i32
    %c0_i32_0 = arith.constant 0 : i32
    %c0_i32_1 = arith.constant 0 : i32
    return %arg0, %c0_i32, %c0_i32_0 : i32, i32, i32
  }
  func.func @transform_1(%arg0: i32) -> (i32, i32) {
    %c0_i32 = arith.constant 0 : i32
    %c0_i32_0 = arith.constant 0 : i32
    %c0_i32_1 = arith.constant 0 : i32
    return %c0_i32, %c0_i32_0 : i32, i32
  }
  func.func @transform_2(%arg0: i32) -> (i32, i32) {
    %c0_i32 = arith.constant 0 : i32
    %c0_i32_0 = arith.constant 0 : i32
    %c0_i32_1 = arith.constant 0 : i32
    return %c0_i32, %c0_i32_0 : i32, i32
  }
  func.func @transform_3(%arg0: i32) -> (i32, i32) {
    %c0_i32 = arith.constant 0 : i32
    %c0_i32_0 = arith.constant 0 : i32
    %c0_i32_1 = arith.constant 0 : i32
    return %c0_i32, %c0_i32_0 : i32, i32
  }
  func.func @transform_4(%arg0: i32) -> (i32, i32, i32) {
    %c0_i32 = arith.constant 0 : i32
    %c0_i32_0 = arith.constant 0 : i32
    %c0_i32_1 = arith.constant 0 : i32
    return %arg0, %c0_i32, %c0_i32_0 : i32, i32, i32
  }
}

module attributes {stable_mosaic.version = 11 : i64} {
  func.func @_conv_bn_lrelu_linear_kernel(%arg0: memref<9x1xf32, #tpu.memory_space<vmem>>, %arg1: memref<10x32xbf16, #tpu.memory_space<vmem>>, %arg2: memref<32x32xbf16, #tpu.memory_space<vmem>>, %arg3: memref<32x32xbf16, #tpu.memory_space<vmem>>, %arg4: memref<1x32xf32, #tpu.memory_space<vmem>>, %arg5: memref<1x32xf32, #tpu.memory_space<vmem>>, %arg6: memref<4x32xf32, #tpu.memory_space<vmem>>, %arg7: memref<1x1xf32, #tpu.memory_space<vmem>>, %arg8: memref<2x1xf32, #tpu.memory_space<vmem>>, %arg9: memref<9x32xf32, #tpu.memory_space<vmem>>) attributes {dimension_semantics = [], scalar_prefetch = 0 : i64, scratch_operands = 1 : i64, tpu.core_type = #tpu.core_type<tc>} {
    %c0 = arith.constant 0 : index
    %c0_0 = arith.constant 0 : index
    %0 = vector.load %arg1[%c0, %c0_0] : memref<10x32xbf16, #tpu.memory_space<vmem>>, vector<9x32xbf16>
    %c1 = arith.constant 1 : index
    %c0_1 = arith.constant 0 : index
    %1 = vector.load %arg1[%c1, %c0_1] : memref<10x32xbf16, #tpu.memory_space<vmem>>, vector<9x32xbf16>
    %c0_2 = arith.constant 0 : index
    %c0_3 = arith.constant 0 : index
    %2 = vector.load %arg2[%c0_2, %c0_3] : memref<32x32xbf16, #tpu.memory_space<vmem>>, vector<32x32xbf16>
    %cst = arith.constant dense<0.000000e+00> : vector<9x32xf32>
    %3 = tpu.matmul %0, %2, %cst {dimension_numbers = #tpu.dot_dimension_numbers<[1], [0], [0], [1], [0, 0, 1, 1], [], []>} : vector<9x32xbf16>, vector<32x32xbf16>, vector<9x32xf32> -> vector<9x32xf32>
    %c0_4 = arith.constant 0 : index
    %c0_5 = arith.constant 0 : index
    %4 = vector.load %arg3[%c0_4, %c0_5] : memref<32x32xbf16, #tpu.memory_space<vmem>>, vector<32x32xbf16>
    %cst_6 = arith.constant dense<0.000000e+00> : vector<9x32xf32>
    %5 = tpu.matmul %1, %4, %cst_6 {dimension_numbers = #tpu.dot_dimension_numbers<[1], [0], [0], [1], [0, 0, 1, 1], [], []>} : vector<9x32xbf16>, vector<32x32xbf16>, vector<9x32xf32> -> vector<9x32xf32>
    %6 = arith.addf %3, %5 : vector<9x32xf32>
    %c0_7 = arith.constant 0 : index
    %c0_8 = arith.constant 0 : index
    %7 = vector.load %arg0[%c0_7, %c0_8] : memref<9x1xf32, #tpu.memory_space<vmem>>, vector<9x1xf32>
    %8 = vector.broadcast %7 : vector<9x1xf32> to vector<9x32xf32>
    %9 = arith.mulf %6, %8 : vector<9x32xf32>
    %cst_9 = arith.constant dense<0.000000e+00> : vector<32xf32>
    %10 = vector.multi_reduction <add>, %9, %cst_9 [0] : vector<9x32xf32> to vector<32xf32>
    %11 = vector.shape_cast %10 : vector<32xf32> to vector<1x32xf32>
    %cst_10 = arith.constant 8.000000e+00 : f32
    %12 = vector.broadcast %cst_10 : f32 to vector<1x32xf32>
    %13 = arith.divf %11, %12 : vector<1x32xf32>
    %14 = vector.broadcast %13 : vector<1x32xf32> to vector<9x32xf32>
    %15 = arith.subf %6, %14 : vector<9x32xf32>
    %16 = vector.broadcast %7 : vector<9x1xf32> to vector<9x32xf32>
    %17 = arith.mulf %15, %16 : vector<9x32xf32>
    %18 = arith.mulf %17, %17 : vector<9x32xf32>
    %cst_11 = arith.constant dense<0.000000e+00> : vector<32xf32>
    %19 = vector.multi_reduction <add>, %18, %cst_11 [0] : vector<9x32xf32> to vector<32xf32>
    %20 = vector.shape_cast %19 : vector<32xf32> to vector<1x32xf32>
    %cst_12 = arith.constant 8.000000e+00 : f32
    %21 = vector.broadcast %cst_12 : f32 to vector<1x32xf32>
    %22 = arith.divf %20, %21 : vector<1x32xf32>
    %c0_13 = arith.constant 0 : index
    %c0_14 = arith.constant 0 : index
    %23 = vector.load %arg4[%c0_13, %c0_14] : memref<1x32xf32, #tpu.memory_space<vmem>>, vector<1x32xf32>
    %cst_15 = arith.constant 9.99999974E-6 : f32
    %24 = vector.broadcast %cst_15 : f32 to vector<1x32xf32>
    %25 = arith.addf %22, %24 : vector<1x32xf32>
    %26 = math.rsqrt %25 : vector<1x32xf32>
    %27 = arith.mulf %23, %26 : vector<1x32xf32>
    %c0_16 = arith.constant 0 : index
    %c0_17 = arith.constant 0 : index
    %28 = vector.load %arg5[%c0_16, %c0_17] : memref<1x32xf32, #tpu.memory_space<vmem>>, vector<1x32xf32>
    %29 = arith.mulf %13, %27 : vector<1x32xf32>
    %30 = arith.subf %28, %29 : vector<1x32xf32>
    %31 = vector.broadcast %27 : vector<1x32xf32> to vector<9x32xf32>
    %32 = arith.mulf %6, %31 : vector<9x32xf32>
    %33 = vector.broadcast %30 : vector<1x32xf32> to vector<9x32xf32>
    %34 = arith.addf %32, %33 : vector<9x32xf32>
    %cst_18 = arith.constant 0.000000e+00 : f32
    %35 = vector.broadcast %cst_18 : f32 to vector<9x32xf32>
    %36 = arith.cmpf oge, %34, %35 : vector<9x32xf32>
    %cst_19 = arith.constant 2.000000e-01 : f32
    %37 = vector.broadcast %cst_19 : f32 to vector<9x32xf32>
    %38 = arith.mulf %37, %34 : vector<9x32xf32>
    %39 = arith.select %36, %34, %38 : vector<9x32xi1>, vector<9x32xf32>
    %c0_20 = arith.constant 0 : index
    %c0_21 = arith.constant 0 : index
    %40 = vector.load %arg9[%c0_20, %c0_21] : memref<9x32xf32, #tpu.memory_space<vmem>>, vector<9x32xf32>
    tpu.vector_store %arg9[%c0_20, %c0_21], %39 {strides = array<i32>} : memref<9x32xf32, #tpu.memory_space<vmem>>, vector<9x32xf32>,
    %c0_22 = arith.constant 0 : index
    %c0_23 = arith.constant 0 : index
    %41 = vector.load %arg6[%c0_22, %c0_23] : memref<4x32xf32, #tpu.memory_space<vmem>>, vector<4x32xf32>
    %c0_24 = arith.constant 0 : index
    %c0_25 = arith.constant 0 : index
    %42 = vector.load %arg7[%c0_24, %c0_25] : memref<1x1xf32, #tpu.memory_space<vmem>>, vector<1x1xf32>
    %c0_i32 = arith.constant 0 : i32
    %c2_i32 = arith.constant 2 : i32
    %43 = arith.addi %c0_i32, %c2_i32 : i32
    %c1_i32 = arith.constant 1 : i32
    scf.for %arg10 = %c0_i32 to %43 step %c1_i32  : i32 {
      %c5_i32 = arith.constant 5 : i32
      %44 = arith.muli %arg10, %c5_i32 : i32
      %45 = arith.index_cast %44 : i32 to index
      %c0_27 = arith.constant 0 : index
      %46 = vector.load %arg9[%45, %c0_27] : memref<9x32xf32, #tpu.memory_space<vmem>>, vector<4x32xf32>
      %47 = arith.mulf %46, %41 : vector<4x32xf32>
      %48 = vector.shape_cast %47 : vector<4x32xf32> to vector<1x4x32xf32>
      %cst_28 = arith.constant dense<0.000000e+00> : vector<1xf32>
      %49 = vector.multi_reduction <add>, %48, %cst_28 [1, 2] : vector<1x4x32xf32> to vector<1xf32>
      %50 = vector.shape_cast %49 : vector<1xf32> to vector<1x1x1xf32>
      %51 = vector.extract %50[0, 0, 0] : f32 from vector<1x1x1xf32>
      %52 = vector.broadcast %51 : f32 to vector<1x1xf32>
      %53 = arith.addf %52, %42 : vector<1x1xf32>
      %54 = arith.index_cast %arg10 : i32 to index
      %c0_29 = arith.constant 0 : index
      %55 = vector.load %arg8[%54, %c0_29] : memref<2x1xf32, #tpu.memory_space<vmem>>, vector<1x1xf32>
      tpu.vector_store %arg8[%54, %c0_29], %53 {strides = array<i32>} : memref<2x1xf32, #tpu.memory_space<vmem>>, vector<1x1xf32>,
    }
    %c2_i32_26 = arith.constant 2 : i32
    return
  }
}

</mosaic_0001>

<bundles_post_ra>
// kernel: data_discriminator_forward.2
= control target key start
LH: loop header
LB: loop body
LE: loop exit
PB: predicated region body
PF: predicated region fallthrough
CT: control target
= control target key end

     0   :  { %vm39_vm0 = vcmask 1043456   ;;  %v365_v0 = vmov 0.0   ;;  %vm366_vm1 = vmmov 0   ;;  %vm35_vm2 = vcmask 64512   ;;  %s501_s1 = inlined_call_operand.vmem [shape: bf16[8,16], index: 1, kind: input, shape index: {}]   ;;  %s502_s2 = inlined_call_operand.vmem [shape: bf16[8,16], index: 2, kind: input, shape index: {}]   ;;  %s503_s0 = inlined_call_operand.vmem [shape: bf16[2,9,8], index: 0, kind: input, shape index: {}]   ;;  %s504_s3 = inlined_call_operand.vmem [shape: f32[1,16], index: 3, kind: input, shape index: {}]   ;;  %s505_s4 = inlined_call_operand.vmem [shape: bf16[2,10,16], index: 4, kind: output, shape index: {}]  }
   0x1   :  { %343 = vmatprep.subr.bf16.mxu1 %v365_v0  ;;  %v18_v1 = vld [vmem:[%s501_s1] sm:$0xf]  ;;  %337 = vmatprep.subr.bf16.mxu0 %v365_v0  ;;  %v22_v6 = vld [vmem:[%s503_s0 + $0x4] sm:$0x1]  ;;  %v313_v7 = vld [vmem:[%s503_s0 + $0x8] sm:$0xf] }
   0x2   :  { %v19_v2 = vld [vmem:[%s502_s2] sm:$0xf]  ;;  %v87_v4 = vsel %vm39_vm0, %v18_v1, 0  ;;  %345 = vmatprep.mubr.msk.bf16.mxu1 %vm366_vm1, %v365_v0  ;;  %339 = vmatprep.mubr.msk.bf16.mxu0 %vm366_vm1, %v365_v0  ;;  %v314_v9 = vld [vmem:[%s503_s0 + $0xc] sm:$0x1]  ;;  %vm153_vm4 = vcmask 125952  }
   0x3   :  { %v21_v3 = vld [vmem:[%s503_s0] sm:$0xf]  ;;  %v41_v5 = vsel %vm39_vm0, %v19_v2, 0  ;;  %344 = vmatpush3.bf16.msra.mxu1 %v87_v4  ;;  %v315_v10 = vcombine.low %v313_v7, %v314_v9  ;;  %vm154_vm5 = vsmask.f32 7938  ;;  %vm159_vm6 = vcmask 122880  }
   0x4   :  { %338 = vmatpush3.bf16.msra.mxu0 %v41_v5  ;;  %v308_v8 = vcombine.low %v21_v3, %v22_v6  ;;  %355 = vmatprep.subr.bf16.mxu1 %v365_v0  ;;  %v311_v23 = vld [vmem:[%s504_s3] ss:$0 sm:$0xff]  ;;  %vm160_vm7 = vsmask.f32 256  ;;  %vm422_vm8 = vmand %vm153_vm4, %vm154_vm5  ;;  %v162_v49 = vld [vmem:[%s505_s4 + $0x4] sm:$0x1] }
   0x5   :  { %349 = vmatprep.subr.bf16.mxu0 %v365_v0  ;;  %v183_v14 = vshll.u32 %v315_v10, 16  ;;  %v181_v16 = vshrl.u32 %v315_v10, 16  ;;  %v156_v47 = vld [vmem:[%s505_s4] sm:$0xf]  ;;  %vm430_vm9 = vmand %vm159_vm6, %vm160_vm7  ;;  %v319_v60 = vld [vmem:[%s505_s4 + $0x8] sm:$0xf] }
   0x6   :  { %v29_v11 = vshrl.u32 %v308_v8, 16  ;;  %v31_v12 = vshll.u32 %v308_v8, 16  ;;  %346 = vmatmul.mubr.msk.bf16.vlgmr.msra.gmra.mrb[0].mxu1 %vm35_vm2, %v21_v3  ;;  %v321_v61 = vld [vmem:[%s505_s4 + $0xc] sm:$0x1]  ;;  %vm455_vm11 = vmand %vm159_vm6, %vm154_vm5 }
   0x7   :  { %356 = vmatpush3.bf16.msra.mxu1 %v87_v4  ;;  %357 = vmatprep.mubr.msk.bf16.mxu1 %vm366_vm1, %v365_v0  ;;  %v185_v17 = vrot.slane %v183_v14, 1 }
   0x8   :  { %v33_v13 = vrot.slane %v31_v12, 1 }
   0x9   :  { %v186_v18 = vor.u32 %v185_v17, %v181_v16 }
   0xa   :  { %v34_v15 = vor.u32 %v33_v13, %v29_v11 }
   0xc   :  { %340 = vmatmul.mubr.msk.bf16.vlgmr.msra.gmra.mrb[0].mxu0 %vm35_vm2, %v34_v15 }
   0xd   :  { %350 = vmatpush3.bf16.msra.mxu0 %v41_v5  ;;  %351 = vmatprep.mubr.msk.bf16.mxu0 %vm366_vm1, %v365_v0 }
   0xe   :  { %358 = vmatmul.mubr.msk.bf16.vlgmr.msra.gmra.mrb[4].mxu1 %vm35_vm2, %v313_v7 }
  0x14   :  { %352 = vmatmul.mubr.msk.bf16.vlgmr.msra.gmra.mrb[4].mxu0 %vm35_vm2, %v186_v18 }
  0xd9   :  { %v123_v19 = vpop.f32.mrb[0].mxu1 }
  0xda   :  { %v347_v20 = vpop.f32.mrb[1].mxu1 }
  0xdb   :  { %v126_v21 = vpop.f32.mrb[2].mxu1 }
  0xdc   :  { %v348_v22 = vpop.f32.mrb[3].mxu1 }
  0xdf   :  { %v77_v24 = vpop.f32.mrb[0].mxu0 }
  0xe0   :  { %v124_v25 = vadd.f32 %v123_v19, %v77_v24  ;;  %v341_v26 = vpop.f32.mrb[1].mxu0 }
  0xe1   :  { %v80_v27 = vpop.f32.mrb[2].mxu0  ;;  %v267_v30 = vpop.f32.mrb[4].mxu1 }
  0xe2   :  { %v135_v28 = vadd.f32 %v311_v23, %v124_v25  ;;  %v342_v29 = vpop.f32.mrb[3].mxu0  ;;  %v359_v31 = vpop.f32.mrb[5].mxu1 }
  0xe3   :  { %v270_v33 = vpop.f32.mrb[6].mxu1 }
  0xe4   :  { %vm136_vm3 = vcmp.ge.f32.partialorder %v135_v28, 0.0  ;;  %v137_v32 = vmul.f32 0.2, %v135_v28  ;;  %v360_v34 = vpop.f32.mrb[7].mxu1 }
  0xe6   :  { %v138_v35 = vsel %vm136_vm3, %v135_v28, %v137_v32 }
  0xe7   :  { %v327_v36 = vpack.c.bf16 %v138_v35, %v138_v35  ;;  %v224_v37 = vpop.f32.mrb[4].mxu0 }
  0xe8   :  { %v268_v38 = vadd.f32 %v267_v30, %v224_v37  ;;  %v353_v39 = vpop.f32.mrb[5].mxu0 }
  0xe9   :  { %v144_v40 = vshrl.u32 %v327_v36, 16  ;;  %v227_v41 = vpop.f32.mrb[6].mxu0  ;;  %v147_v45 = vshll.u32 %v327_v36, 16 }
  0xea   :  { %v273_v42 = vadd.f32 %v311_v23, %v268_v38  ;;  %v354_v43 = vpop.f32.mrb[7].mxu0 }
  0xeb   :  { %v146_v44 = vrot.slane %v144_v40, 7 }
  0xec   :  { %vm274_vm10 = vcmp.ge.f32.partialorder %v273_v42, 0.0  ;;  %v275_v50 = vmul.f32 0.2, %v273_v42 }
  0xed   :  { %v149_v51 = vor.u32 %v147_v45, %v146_v44  ;;  %v150_v52 = vrot.slane %v146_v44, 4 }
  0xee   :  { %v276_v53 = vsel %vm274_vm10, %v273_v42, %v275_v50 }
  0xef   :  { %v157_v54 = vsel %vm422_vm8, %v149_v51, %v156_v47  ;;  %v163_v55 = vsel %vm430_vm9, %v150_v52, %v162_v49  ;;  %v328_v56 = vpack.c.bf16 %v276_v53, %v276_v53 }
  0xf0   :  { %158 = vst [vmem:[%s505_s4] sm:$0xf] %v157_v54  ;;  %164 = vst [vmem:[%s505_s4 + $0x4] sm:$0x1] %v163_v55 }
  0xf1   :  { %v282_v57 = vshrl.u32 %v328_v56, 16  ;;  %v285_v59 = vshll.u32 %v328_v56, 16 }
  0xf3   :  { %v284_v58 = vrot.slane %v282_v57, 7 }
  0xf5   :  { %v287_v63 = vor.u32 %v285_v59, %v284_v58  ;;  %v288_v0 = vrot.slane %v284_v58, 4 }
  0xf7   :  { %v165_v1 = vld [vmem:[%s505_s4] sm:$0x1]  ;;  %v169_v2 = vld [vmem:[%s505_s4 + $0x4] sm:$0x1]  ;;  %v293_v3 = vsel %vm422_vm8, %v287_v63, %v319_v60  ;;  %v296_v4 = vsel %vm430_vm9, %v288_v0, %v321_v61 }
  0xf8   :  { %v166_v5 = vsel %vm430_vm9, 0, %v165_v1  ;;  %v170_v6 = vsel %vm455_vm11, 0, %v169_v2  ;;  %320 = vst [vmem:[%s505_s4 + $0x8] sm:$0xf] %v293_v3  ;;  %322 = vst [vmem:[%s505_s4 + $0xc] sm:$0x1] %v296_v4 }
  0xf9   :  { %167 = vst [vmem:[%s505_s4] sm:$0x1] %v166_v5  ;;  %171 = vst [vmem:[%s505_s4 + $0x4] sm:$0x1] %v170_v6 }
  0xff   :  { %v323_v7 = vld [vmem:[%s505_s4 + $0x8] sm:$0x1]  ;;  %v325_v8 = vld [vmem:[%s505_s4 + $0xc] sm:$0x1] }
 0x100   :  { %v299_v9 = vsel %vm430_vm9, 0, %v323_v7  ;;  %v302_v10 = vsel %vm455_vm11, 0, %v325_v8 }
 0x101   :  { %324 = vst [vmem:[%s505_s4 + $0x8] sm:$0x1] %v299_v9  ;;  %326 = vst [vmem:[%s505_s4 + $0xc] sm:$0x1] %v302_v10 }

// kernel: data_discriminator_forward.3
= control target key start
LH: loop header
LB: loop body
LE: loop exit
PB: predicated region body
PF: predicated region fallthrough
CT: control target
= control target key end

     0   :  { %v339_v1 = vmov 0.0   ;;  %vm340_vm0 = vmmov 0   ;;  %v341_v5 = vmov 0   ;;  %vm66_vm1 = vcmask 261120   ;;  %s437_s7 = inlined_call_operand.<no memory space> [shape: f32[1,1], index: 7, kind: input, shape index: {}]   ;;  %s438_s8 = inlined_call_operand.vmem [shape: f32[2,1], index: 8, kind: output, shape index: {}]   ;;  %s439_s3 = inlined_call_operand.vmem [shape: bf16[32,32], index: 3, kind: input, shape index: {}]   ;;  %s440_s2 = inlined_call_operand.vmem [shape: bf16[32,32], index: 2, kind: input, shape index: {}]   ;;  %s441_s1 = inlined_call_operand.vmem [shape: bf16[10,32], index: 1, kind: input, shape index: {}]   ;;  %s442_s0 = inlined_call_operand.vmem [shape: f32[9,1], index: 0, kind: input, shape index: {}]   ;;  %s443_s6 = inlined_call_operand.vmem [shape: f32[4,32], index: 6, kind: input, shape index: {}]   ;;  %s444_s4 = inlined_call_operand.vmem [shape: f32[1,32], index: 4, kind: input, shape index: {}]   ;;  %s445_s5 = inlined_call_operand.vmem [shape: f32[1,32], index: 5, kind: input, shape index: {}]  }
   0x1   :  { %v13_v0 = vstv %s437_s7  ;;  %292 = vmatprep.subr.bf16.mxu1 %v339_v1  ;;  %300 = vmatprep.subr.bf16.mxu0 %v339_v1  ;;  %v324_v2 = vld [vmem:[%s439_s3] sm:$0xff]   ;;  %v326_v4 = vld [vmem:[%s439_s3 + $0x8] sm:$0xff]   ;;  %vm181_vm2 = vcmask 253952   ;;  %v216_v57 = vlaneseq }
   0x2   :  { %14 = vst [vmem:[#allocation3] sm:$0x1] %v13_v0  ;;  %v325_v3 = vld [vmem:[%s440_s2] sm:$0xff]   ;;  %296 = vmatprep.mubr.msk.bf16.mxu1 %vm340_vm0, %v339_v1  ;;  %304 = vmatprep.mubr.msk.bf16.mxu0 %vm340_vm0, %v339_v1  ;;  %v327_v6 = vld [vmem:[%s440_s2 + $0x8] sm:$0xff]  }
   0x3   :  { %293 = vmatpush3.bf16.msra.mxu1 %v324_v2  ;;  %323 = vset.pattern.permute.xlu0 %v341_v5  ;;  %v328_v7 = vld [vmem:[%s441_s1] sm:$0x1f]   ;;  %v167_v11 = vld [vmem:[%s442_s0 + $0x8] sm:$0x1]  ;;  %v217_v58 = vshrl.u32 %v216_v57, 7 }
   0x4   :  { %301 = vmatpush3.bf16.msra.mxu0 %v325_v3  ;;  %294 = vmatprep.subr.bf16.mxu1 %v339_v1  ;;  %v166_v8 = vld [vmem:[%s442_s0] sm:$0xff]  ;;  %v48_v9 = vshrl.u32 %v328_v7, 16  ;;  %v50_v10 = vshll.u32 %v328_v7, 16 }
   0x5   :  { %302 = vmatprep.subr.bf16.mxu0 %v339_v1  ;;  %170 = vperm.xlu0 %323, %v166_v8   ;;  %v416_v14 = vld [vmem:[%s443_s6] sm:$0xf]  ;;  %v218_v60 = vsub.s32 0, %v217_v58 }
   0x6   :  { %v52_v12 = vrot.slane %v50_v10, 1  ;;  %v208_v59 = vld [vmem:[%s444_s4] sm:$0x1]  ;;  %s335_s4 = smov 0  }
   0x7   :  { %295 = vmatpush3.bf16.msra.mxu1 %v326_v4  ;;  %v212_v63 = vld [vmem:[%s445_s5] sm:$0x1] }
   0x8   :  { %303 = vmatpush3.bf16.msra.mxu0 %v327_v6  ;;  %v53_v13 = vor.u32 %v52_v12, %v48_v9 }
   0x9   :  { %175 = vperm.xlu0 %323, %v167_v11   ;;  %v418_v15 = vld [vmem:[#allocation3] sm:$0x1] }
   0xa   :  { %297 = vmatmul.mubr.msk.bf16.vlgmr.msra.gmra.mrb[0].mxu1 %vm66_vm1, %v53_v13 }
   0xb   :  { %305 = vmatmul.mubr.msk.bf16.vlgmr.msra.gmra.mrb[0].mxu0 %vm66_vm1, %v328_v7 }
  0x84   :  { %v171_v16 = vpop.permute.xlu0 %170 }
  0x88   :  { %v176_v28 = vpop.permute.xlu0 %175 }
  0xdd   :  { %v104_v19 = vpop.f32.mrb[0].mxu1 }
  0xde   :  { %v159_v17 = vpop.f32.mrb[0].mxu0  ;;  %v298_v22 = vpop.f32.mrb[1].mxu1 }
  0xdf   :  { %v306_v18 = vpop.f32.mrb[1].mxu0  ;;  %v160_v21 = vadd.f32 %v159_v17, %v104_v19  ;;  %v107_v24 = vpop.f32.mrb[2].mxu1 }
  0xe0   :  { %v162_v20 = vpop.f32.mrb[2].mxu0  ;;  %v299_v27 = vpop.f32.mrb[3].mxu1 }
  0xe1   :  { %v307_v23 = vpop.f32.mrb[3].mxu0  ;;  %v178_v25 = vmul.f32 %v171_v16, %v160_v21  ;;  %v163_v26 = vadd.f32 %v162_v20, %v107_v24 }
  0xe3   :  { %v179_v29 = vmul.f32 %v176_v28, %v163_v26  ;;  %v180_v30 = vsel %vm66_vm1, %v178_v25, 0.0 }
  0xe5   :  { %v182_v31 = vsel %vm181_vm2, %v179_v29, 0.0 }
  0xe6   :  { %v183_v32 = vadd.f32 %v182_v31, %v180_v30 }
  0xe8   :  { %v184_v33 = vrot.slane %v183_v32, 4 }
  0xea   :  { %v185_v34 = vadd.f32 %v184_v33, %v183_v32 }
  0xec   :  { %v186_v35 = vrot.slane %v185_v34, 2 }
  0xee   :  { %v187_v36 = vadd.f32 %v186_v35, %v185_v34 }
  0xf0   :  { %v188_v37 = vrot.slane %v187_v36, 1 }
  0xf2   :  { %v189_v38 = vadd.f32 %v188_v37, %v187_v36 }
  0xf4   :  { %v191_v39 = vmul.f32 0.125, %v189_v38 }
  0xf6   :  { %v192_v40 = vsub.f32 %v160_v21, %v191_v39  ;;  %v193_v41 = vsub.f32 %v163_v26, %v191_v39 }
  0xf8   :  { %v194_v42 = vmul.f32 %v192_v40, %v171_v16  ;;  %v195_v43 = vmul.f32 %v193_v41, %v176_v28 }
  0xfa   :  { %v196_v44 = vmul.f32 %v194_v42, %v194_v42  ;;  %v197_v45 = vmul.f32 %v195_v43, %v195_v43 }
  0xfc   :  { %v198_v46 = vsel %vm66_vm1, %v196_v44, 0.0  ;;  %v199_v47 = vsel %vm181_vm2, %v197_v45, 0.0 }
  0xfd   :  { %v200_v48 = vadd.f32 %v199_v47, %v198_v46 }
  0xff   :  { %v201_v49 = vrot.slane %v200_v48, 4 }
 0x101   :  { %v202_v50 = vadd.f32 %v201_v49, %v200_v48 }
 0x103   :  { %v203_v51 = vrot.slane %v202_v50, 2 }
 0x105   :  { %v204_v52 = vadd.f32 %v203_v51, %v202_v50 }
 0x107   :  { %v205_v53 = vrot.slane %v204_v52, 1 }
 0x109   :  { %v206_v54 = vadd.f32 %v205_v53, %v204_v52 }
 0x10b   :  { %v207_v55 = vmul.f32 0.125, %v206_v54 }
 0x10d   :  { %v209_v56 = vadd.f32 1e-05, %v207_v55 }
 0x10f   :  { %329 = vrsqrt.f32 %v209_v56 }
 0x119   :  { %v330_v61 = vpop.eup %329 }
 0x11a   :  { %v211_v62 = vmul.f32 %v330_v61, %v208_v59 }
 0x11c   :  { %v213_v0 = vmul.f32 %v211_v62, %v191_v39  ;;  %v219_v1 = vrot.slane %v211_v62, %v218_v60 }
 0x11e   :  { %v214_v2 = vsub.f32 %v212_v63, %v213_v0  ;;  %v221_v3 = vmul.f32 %v219_v1, %v160_v21  ;;  %v222_v4 = vmul.f32 %v219_v1, %v163_v26 }
 0x120   :  { %v227_v5 = vrot.slane %v214_v2, %v218_v60 }
 0x122   :  { %v229_v6 = vadd.f32 %v227_v5, %v221_v3  ;;  %v230_v7 = vadd.f32 %v227_v5, %v222_v4 }
 0x124   :  { %vm231_vm3 = vcmp.ge.f32.partialorder %v229_v6, 0.0  ;;  %vm232_vm4 = vcmp.ge.f32.partialorder %v230_v7, 0.0  ;;  %v233_v8 = vmul.f32 0.2, %v229_v6  ;;  %v234_v9 = vmul.f32 0.2, %v230_v7 }
 0x126   :  { %v235_v10 = vsel %vm231_vm3, %v229_v6, %v233_v8  ;;  %v236_v11 = vsel %vm232_vm4, %v230_v7, %v234_v9 }
 0x127   :  { %237 = vst.msk [vmem:[#allocation2] sm:$0xff] %vm66_vm1, %v235_v10 }
 0x128   :  { %238 = vst.msk [vmem:[#allocation2 + $0x8] sm:$0x1] %vm181_vm2, %v236_v11 }
 0x129 LB: > { %s247_s5 = smul.u32 5, %s337_s4  ;;  %vm251_vm5 = vcmask 257024   ;;  %s264_s25 = scalar_lea.vmem %s438_s8, %s337_s4  ;;  %vm265_vm6 = vcmask 0   ;;  %s337_s4 = sphi %s335_s4, %s246_s4  }
 0x12a   : > { %s246_s4 = sadd.s32 1, %s337_s4  }
 0x12b   : > { %s248_s21 = scalar_lea.vmem [#allocation2], %s247_s5  ;;  %p243_p0 = scmp.ge.s32.totalorder %s246_s4, 2  }
 0x12f   : > { %v249_v12 = vld [vmem:[%s248_s21] sm:$0xf] }
 0x130   : > { %v250_v13 = vmul.f32 %v249_v12, %v416_v14 }
 0x132   : > { %v252_v16 = vsel %vm251_vm5, %v250_v13, 0.0 }
 0x133   : > { %253 = vadd.xlane.f32.xlu0 %v252_v16 }
 0x1c0   : > { %v254_v17 = vpop.xlane.xlu0 %253 }
 0x1c1   : > { %v255_v18 = vrot.slane %v254_v17, 4 }
 0x1c3   : > { %v256_v19 = vadd.f32 %v255_v18, %v254_v17 }
 0x1c5   : > { %v257_v20 = vrot.slane %v256_v19, 2 }
 0x1c7   : > { %v258_v21 = vadd.f32 %v257_v20, %v256_v19 }
 0x1c9   : > { %v259_v22 = vrot.slane %v258_v21, 1 }
 0x1cb   : > { %v260_v23 = vadd.f32 %v259_v22, %v258_v21 }
 0x1cd   : > { %310 = vpush %v260_v23 }
 0x1fc   :  { %245 = sbr.rel (!%p243_p0) target bundleno = 297 (0x129), region = 61 }
 0x1fe   : > { %s311_s22 = spop %310 }
 0x1ff   : > { %v262_v24 = vstv %s311_s22 }
 0x200   : > { %v263_v25 = vadd.f32 %v262_v24, %v418_v15 }
 0x202   : > { %266 = vst.msk [vmem:[%s264_s25] sm:$0x1] %vm265_vm6, %v263_v25 }

</bundles_post_ra>
